<compile_context>
chip_gen: v6e
topology: v6e:2x2x1
jax: 0.10.0
libtpu: 0.0.40
codegen_flags: <defaults>
</compile_context>

<pallas_src>
import jax
import jax.numpy as jnp
from jax.experimental import pallas as pl
from jax.experimental.pallas import tpu as pltpu


def _ohm_kernel(r_ref, i_ref, o_ref):
    # r_ref: (1, 1) f32 resistance in SMEM (scalar path)
    # i_ref / o_ref: (block_rows, cols) VMEM tiles
    r = r_ref[0, 0]
    o_ref[...] = (i_ref[...] * r).astype(o_ref.dtype)


def _default_block_bytes():
    """Per-generation VMEM tile budget for this mem-bound streaming kernel."""
    try:
        kind = jax.devices()[0].device_kind.lower()
    except Exception:
        return 2 << 20
    if "v7" in kind:
        return 8 << 20   # 3.2 TB/s HBM: larger tiles amortize per-grid-step overhead
    if "v5e" in kind or "v5 lite" in kind or "v5litepod" in kind:
        return 2 << 20   # stay well inside v5e's 16 MiB default scoped-VMEM limit
    return 4 << 20       # v6e and friends


def ohm_forward(I, resistance, *, target_block_bytes=None):
    """Compute V = I * resistance with a Pallas TPU kernel."""
    orig_shape = I.shape
    in_dtype = I.dtype
    # torch type promotion: a 0-d float parameter does not upcast a floating tensor of the
    # same category; integer tensors promote to the parameter's float32.
    out_dtype = in_dtype if jnp.issubdtype(in_dtype, jnp.floating) else jnp.float32

    n = I.size
    if n == 0:
        return jnp.zeros(orig_shape, out_dtype)

    itemsize = jnp.dtype(in_dtype).itemsize
    lane = 128
    sub = max(8, 32 // itemsize)  # sublane multiple: f32 -> 8, bf16/f16 -> 16, int8 -> 32

    if target_block_bytes is None:
        target_block_bytes = _default_block_bytes()

    # ---- lane-dense 2-D view; avoid pad / slice copies whenever possible --------------
    padded = False
    cols = next((c for c in (1024, 512, 256, lane) if n % c == 0), None)
    if cols is not None:
        rows = n // cols
        x2d = I.reshape(rows, cols)
    elif n * itemsize <= (1 << 20):
        # Small ragged tensor: a single full-dim block is legal; no pad, no slice.
        rows, cols = 1, n
        x2d = I.reshape(rows, cols)
    else:
        # Large ragged tensor: minimal (<128-element) tail pad to a 128-wide slab.
        cols = lane
        rows = pl.cdiv(n, cols)
        flat = jnp.pad(I.reshape(-1), (0, rows * cols - n))
        x2d = flat.reshape(rows, cols)
        padded = True

    # ---- block rows: ~target bytes per tile, sublane aligned, >= 2 grid steps ---------
    if rows <= sub:
        block_rows = rows  # full-dim block (always a legal BlockSpec)
    else:
        block_rows = max(sub, (target_block_bytes // (cols * itemsize)) // sub * sub)
        if rows >= 2 * sub:
            # Guarantee at least 2 grid steps so v7x's two TensorCores both get work.
            block_rows = min(block_rows, max(sub, (rows // 2) // sub * sub))
        block_rows = min(block_rows, rows)

    grid = (pl.cdiv(rows, block_rows),)

    # Scoped-VMEM: double-buffered input + output tiles plus a little headroom.
    out_itemsize = jnp.dtype(out_dtype).itemsize
    vmem_need = 2 * block_rows * cols * (itemsize + out_itemsize) + (4 << 20)
    vmem_limit = int(min(48 << 20, max(16 << 20, vmem_need)))

    r_arr = jnp.asarray(resistance, dtype=jnp.float32).reshape(1, 1)

    out2d = pl.pallas_call(
        _ohm_kernel,
        out_shape=jax.ShapeDtypeStruct((rows, cols), out_dtype),
        grid_spec=pltpu.PrefetchScalarGridSpec(
            num_scalar_prefetch=0,
            grid=grid,
            in_specs=[
                pl.BlockSpec(memory_space=pltpu.SMEM),                # resistance (1, 1)
                pl.BlockSpec((block_rows, cols), lambda i: (i, 0)),   # current tile
            ],
            out_specs=pl.BlockSpec((block_rows, cols), lambda i: (i, 0)),
        ),
        compiler_params=pltpu.CompilerParams(
            dimension_semantics=("parallel",),
            vmem_limit_bytes=vmem_limit,
        ),
    )(r_arr, x2d)

    if padded:
        return out2d.reshape(-1)[:n].reshape(orig_shape)
    return out2d.reshape(orig_shape)


if __name__ == "__main__":
    key = jax.random.PRNGKey(0)

    # Parameter init matches nn.Parameter(torch.tensor(1.0))
    resistance = jnp.float32(1.0)

    # Example current tensor, shape (2, 4, 16, 16)
    I = jax.random.normal(key, (2, 4, 16, 16), dtype=jnp.float32)
    V = ohm_forward(I, resistance)
    jax.block_until_ready(V)

    V_ref = I * resistance
    assert V.shape == I.shape and V.dtype == V_ref.dtype
    assert jnp.allclose(V, V_ref, atol=1e-6, rtol=1e-6)

    # Ragged-size path (no padding, single full-dim block) with non-trivial resistance.
    I2 = jax.random.normal(jax.random.PRNGKey(1), (3, 5, 7), dtype=jnp.float32)
    V2 = ohm_forward(I2, jnp.float32(2.5))
    jax.block_until_ready(V2)
    assert jnp.allclose(V2, I2 * 2.5, atol=1e-5, rtol=1e-5)

    print("KERNEL_OK")
</pallas_src>

<mosaic_0001>
module attributes {stable_mosaic.version = 11 : i64} {
  func.func @_ohm_kernel(%arg0: i32, %arg1: memref<1x1xf32, #tpu.memory_space<smem>>, %arg2: memref<2x1024xf32, #tpu.memory_space<vmem>>, %arg3: memref<2x1024xf32, #tpu.memory_space<vmem>>) attributes {dimension_semantics = [#tpu.dimension_semantics<parallel>], iteration_bounds = array<i64: 1>, scalar_prefetch = 0 : i64, scratch_operands = 0 : i64, tpu.core_type = #tpu.core_type<tc>, window_params = [{transform_indices = @transform_0, window_bounds = array<i64: 1, 1>}, {transform_indices = @transform_1, window_bounds = array<i64: 2, 1024>}, {transform_indices = @transform_2, window_bounds = array<i64: 2, 1024>}]} {
    %c0 = arith.constant 0 : index
    %c0_0 = arith.constant 0 : index
    %0 = memref.load %arg1[%c0, %c0_0] : memref<1x1xf32, #tpu.memory_space<smem>>
    %c0_1 = arith.constant 0 : index
    %c0_2 = arith.constant 0 : index
    %1 = vector.load %arg2[%c0_1, %c0_2] : memref<2x1024xf32, #tpu.memory_space<vmem>>, vector<2x1024xf32>
    %2 = vector.broadcast %0 : f32 to vector<2x1024xf32>
    %3 = arith.mulf %1, %2 : vector<2x1024xf32>
    %c0_3 = arith.constant 0 : index
    %c0_4 = arith.constant 0 : index
    %4 = vector.load %arg3[%c0_3, %c0_4] : memref<2x1024xf32, #tpu.memory_space<vmem>>, vector<2x1024xf32>
    tpu.vector_store %arg3[%c0_3, %c0_4], %3 {strides = array<i32>} : memref<2x1024xf32, #tpu.memory_space<vmem>>, vector<2x1024xf32>,
    return
  }
  func.func @transform_0(%arg0: i32) -> (i32, i32) {
    %c0_i32 = arith.constant 0 : i32
    %c0_i32_0 = arith.constant 0 : i32
    %c0_i32_1 = arith.constant 0 : i32
    return %c0_i32, %c0_i32_0 : i32, i32
  }
  func.func @transform_1(%arg0: i32) -> (i32, i32) {
    %c0_i32 = arith.constant 0 : i32
    %c0_i32_0 = arith.constant 0 : i32
    return %arg0, %c0_i32 : i32, i32
  }
  func.func @transform_2(%arg0: i32) -> (i32, i32) {
    %c0_i32 = arith.constant 0 : i32
    %c0_i32_0 = arith.constant 0 : i32
    return %arg0, %c0_i32 : i32, i32
  }
}

</mosaic_0001>

<bundles_post_ra>
// kernel: tpu_custom_call.1
= control target key start
LH: loop header
LB: loop body
LE: loop exit
PB: predicated region body
PF: predicated region fallthrough
CT: control target
= control target key end

     0   :  { %8 = vsyncpa [#allocation4], 0  ;;  %s120_s0 = inlined_call_operand.<no memory space> [shape: f32[1,1], index: 0, kind: input, shape index: {}]   ;;  %s121_s1 = inlined_call_operand.hbm [shape: f32[2,1024], index: 1, kind: input, shape index: {}]   ;;  %s122_s2 = inlined_call_operand.hbm [shape: f32[2,1024], index: 2, kind: output, shape index: {}]  }
   0x1   :  { %9 = vsyncpa [#allocation5], 0  ;;  %s94_s9 = smov [#allocation3]  }
   0x2   :  { %s18_s10 = sshll.u32 %s94_s9, 4  ;;  %s19_s10 = int_to_ptr.vmem [resolvable:$true] %s18_s10 }
   0x3   :  { %s58_s11 = scalar_lea.vmem %s19_s10, 256  ;;  %p63_p1 = scmp.lt.s32.totalorder %s19_s10, %s19_s10 }
   0x4   :  { %p59_p0 = scmp.ne.s32.totalorder %s19_s10, %s58_s11  ;;  %p64_p2 = scmp.lt.s32.totalorder %s58_s11, %s58_s11 }
   0x6   :  { %p65_p3 = por %p64_p2, %p63_p1 }
   0x8   :  { %p66_p4 = pnand %p65_p3, %p59_p0 }
   0xa   :  { %69 = shalt.err (!%p66_p4)
}
   0xb   :  { %21 = dma.hbm_to_vmem [thread:$0]  %s121_s1, 256, %s19_s10, [#allocation4]  }
   0xc   :  { %90 = dma.done.wait [#allocation4], 256  }
   0xd   :  { %91 = vsyncadd [#allocation4], 4294967040  ;;  %v28_v0 = vstv %s120_s0  ;;  %s95_s16 = smov [#allocation6]   ;;  %v26_v1 = vld [vmem:[#allocation3] sm:$0xff]  ;;  %v27_v2 = vld [vmem:[#allocation3 + $0x8] sm:$0xff] }
   0xe   :  { %s39_s17 = sshll.u32 %s95_s16, 4  ;;  %v29_v3 = vmul.f32 %v28_v0, %v26_v1  ;;  %v30_v4 = vmul.f32 %v28_v0, %v27_v2  ;;  %s40_s17 = int_to_ptr.vmem [resolvable:$true] %s39_s17 }
   0xf   :  { %s70_s18 = scalar_lea.vmem %s40_s17, 256  ;;  %p75_p6 = scmp.lt.s32.totalorder %s40_s17, %s40_s17 }
  0x10   :  { %31 = vst [vmem:[#allocation6] sm:$0xff] %v29_v3  ;;  %32 = vst [vmem:[#allocation6 + $0x8] sm:$0xff] %v30_v4  ;;  %p71_p5 = scmp.ne.s32.totalorder %s40_s17, %s70_s18  ;;  %p76_p7 = scmp.lt.s32.totalorder %s70_s18, %s70_s18 }
  0x12   :  { %p77_p8 = por %p76_p7, %p75_p6 }
  0x14   :  { %p78_p9 = pnand %p77_p8, %p71_p5 }
  0x16   :  { %81 = shalt.err (!%p78_p9)
}
  0x17   :  { %42 = dma.vmem_to_hbm [thread:$0]  %s40_s17, 256, %s122_s2, [#allocation5]  }
  0x18   :  { %92 = dma.done.wait [#allocation5], 256  }
  0x19   :  { %93 = vsyncadd [#allocation5], 4294967040 }
  0x1a   :  { %46 = vsyncpa [#allocation4], 1 }
  0x1b   :  { %47 = vsyncpa [#allocation5], 1 }

</bundles_post_ra>
